<compile_context>
chip_gen: v7x
topology: tpu7x:2x2x1
jax: 0.10.0
libtpu: 0.0.40
codegen_flags: <defaults>
</compile_context>

<pallas_src>
import jax
import jax.numpy as jnp
from jax.experimental import pallas as pl
from jax.experimental.pallas import tpu as pltpu


# ---------------------------------------------------------------------------
# Problem sizes (small, consistent with the module: context_dim=6)
# ---------------------------------------------------------------------------
BATCH = 32                            # total batch (single kernel invocation)
XT_DIM = 32                           # evolving part of x
CONTEXT_DIM = 6                       # frozen context
X_DIM = XT_DIM + CONTEXT_DIM          # full input width  (38)
IN_DIM = X_DIM + 1                    # base-model input width [xt, ctx, t] (39)
HIDDEN = 64
OUT_PAD = 128                         # lane-dense kernel output width


def model_wrapper_kernel(t_ref, x_ref, w1x_ref, w1t_ref, b1_ref,
                         w2p_ref, b2p_ref, out_ref):
    """Fused ModelWrapper forward; whole batch in one invocation.

    t_ref   : (1, 1)             SMEM scalar flow time
    x_ref   : (B, X_DIM)         [xt | context]  (no split needed)
    w1x_ref : (X_DIM, HIDDEN)    rows of W1 acting on x
    w1t_ref : (1, HIDDEN)        row of W1 acting on t
    b1_ref  : (1, HIDDEN)
    w2p_ref : (HIDDEN, OUT_PAD)  W2 zero-padded beyond column XT_DIM
    b2p_ref : (1, OUT_PAD)       b2 zero-padded beyond column XT_DIM
    out_ref : (B, OUT_PAD)       [dxt_dt | exact zeros | pad]
    """
    t = t_ref[0, 0]                                           # scalar (SMEM)

    # h = [x | t] @ W1 + b1   ==   x @ W1_x + t * w1_t + b1   (no lane concat)
    h = jnp.dot(x_ref[...], w1x_ref[...],
                preferred_element_type=jnp.float32)
    h = h + t * w1t_ref[...] + b1_ref[...]
    h = h * jax.nn.sigmoid(h)                                 # SiLU (EUP)

    # Zero-padded W2/b2 emit [dxt_dt | 0...] directly -> no output concat,
    # single lane-dense unmasked store.
    out_ref[...] = (jnp.dot(h, w2p_ref[...],
                            preferred_element_type=jnp.float32)
                    + b2p_ref[...])


def prepare_base_model_params(w1, b1, w2, b2):
    """One-time weight restructuring (do NOT run per forward call).

    Splits W1 into an x-part and a t-part (kills the [xt|ctx|t] concat) and
    zero-pads W2/b2 to a lane-dense width so the kernel output is already
    [dxt_dt | exact zeros | pad].
    """
    w1_x = w1[:X_DIM, :]                                   # (X_DIM, HIDDEN)
    w1_t = w1[X_DIM:, :]                                   # (1, HIDDEN)
    w2_pad = jnp.zeros((HIDDEN, OUT_PAD), w2.dtype).at[:, :XT_DIM].set(w2)
    b2_pad = jnp.zeros((1, OUT_PAD), b2.dtype).at[:, :XT_DIM].set(b2)
    return w1_x, w1_t, b1, w2_pad, b2_pad


def model_wrapper_forward_padded(t, x, w1_x, w1_t, b1, w2_pad, b2_pad):
    """Jitted per-call path: a single grid-less pallas_call, nothing else.

    Returns the lane-dense padded output (B, OUT_PAD); columns
    [XT_DIM:X_DIM] are the exact zeros_for_context and [X_DIM:] are exact
    zero padding. Consumers needing the narrow (B, X_DIM) view slice it
    themselves (keeps the lane-sparse copy out of the hot path).
    """
    B = x.shape[0]
    t_s = jnp.reshape(t, (1, 1)).astype(jnp.float32)       # SMEM scalar

    return pl.pallas_call(
        model_wrapper_kernel,
        out_shape=jax.ShapeDtypeStruct((B, OUT_PAD), jnp.float32),
        in_specs=[
            pl.BlockSpec(memory_space=pltpu.MemorySpace.SMEM),   # t scalar
            pl.BlockSpec(memory_space=pltpu.MemorySpace.VMEM),   # x
            pl.BlockSpec(memory_space=pltpu.MemorySpace.VMEM),   # w1_x
            pl.BlockSpec(memory_space=pltpu.MemorySpace.VMEM),   # w1_t
            pl.BlockSpec(memory_space=pltpu.MemorySpace.VMEM),   # b1
            pl.BlockSpec(memory_space=pltpu.MemorySpace.VMEM),   # w2_pad
            pl.BlockSpec(memory_space=pltpu.MemorySpace.VMEM),   # b2_pad
        ],
        out_specs=pl.BlockSpec(memory_space=pltpu.MemorySpace.VMEM),
    )(t_s, x, w1_x, w1_t, b1, w2_pad, b2_pad)


def model_wrapper_reference(t, x, w1, b1, w2, b2):
    """Pure-JAX reference matching the original module semantics."""
    xt, context = x[:, :-CONTEXT_DIM], x[:, -CONTEXT_DIM:]
    t_b = jnp.broadcast_to(jnp.reshape(t, (1, 1)), (x.shape[0], 1))
    inp = jnp.concatenate([xt, context, t_b], axis=-1)
    h = inp @ w1 + b1
    h = h * jax.nn.sigmoid(h)                              # SiLU
    dxt_dt = h @ w2 + b2
    return jnp.concatenate([dxt_dt, jnp.zeros_like(context)], axis=-1)


if __name__ == "__main__":
    key = jax.random.PRNGKey(0)
    k_x, k_t, k_w1, k_b1, k_w2, k_b2 = jax.random.split(key, 6)

    # Inputs
    x = jax.random.normal(k_x, (BATCH, X_DIM), dtype=jnp.float32)
    t = jax.random.uniform(k_t, (1, 1), dtype=jnp.float32)

    # Deterministic synthetic base-model parameters (2-layer SiLU MLP).
    # TODO(synk): base_model is abstract in the original module; this MLP is a
    # stand-in with the same call signature (xt, context, flow_time).
    w1 = jax.random.normal(k_w1, (IN_DIM, HIDDEN), dtype=jnp.float32) * 0.1
    b1 = jax.random.normal(k_b1, (1, HIDDEN), dtype=jnp.float32) * 0.01
    w2 = jax.random.normal(k_w2, (HIDDEN, XT_DIM), dtype=jnp.float32) * 0.1
    b2 = jax.random.normal(k_b2, (1, XT_DIM), dtype=jnp.float32) * 0.01

    # One-time weight prep (outside the jitted per-call path).
    w1_x, w1_t, b1_p, w2_pad, b2_pad = jax.block_until_ready(
        prepare_base_model_params(w1, b1, w2, b2))

    fwd = jax.jit(model_wrapper_forward_padded)
    out_padded = jax.block_until_ready(fwd(t, x, w1_x, w1_t, b1_p, w2_pad, b2_pad))

    # Verification (narrow slice done only here, outside the hot path).
    ref = model_wrapper_reference(t, x, w1, b1, w2, b2)
    out = out_padded[:, :X_DIM]
    assert out_padded.shape == (BATCH, OUT_PAD)
    assert out.shape == (BATCH, X_DIM)
    assert jnp.allclose(out, ref, atol=1e-4, rtol=1e-4)
    # Context columns must be exactly zero (zeros_for_context semantics),
    # and the lane padding beyond X_DIM must also be exactly zero.
    assert jnp.all(out[:, -CONTEXT_DIM:] == 0.0)
    assert jnp.all(out_padded[:, X_DIM:] == 0.0)

    print("KERNEL_OK")
</pallas_src>

<mosaic_0001>
module attributes {stable_mosaic.version = 11 : i64} {
  func.func @model_wrapper_kernel(%arg0: memref<1x1xf32, #tpu.memory_space<smem>>, %arg1: memref<32x38xf32, #tpu.memory_space<vmem>>, %arg2: memref<38x64xf32, #tpu.memory_space<vmem>>, %arg3: memref<1x64xf32, #tpu.memory_space<vmem>>, %arg4: memref<1x64xf32, #tpu.memory_space<vmem>>, %arg5: memref<64x128xf32, #tpu.memory_space<vmem>>, %arg6: memref<1x128xf32, #tpu.memory_space<vmem>>, %arg7: memref<32x128xf32, #tpu.memory_space<vmem>>) attributes {dimension_semantics = [], scalar_prefetch = 0 : i64, scratch_operands = 0 : i64, tpu.core_type = #tpu.core_type<tc>} {
    %c0 = arith.constant 0 : index
    %c0_0 = arith.constant 0 : index
    %0 = memref.load %arg0[%c0, %c0_0] : memref<1x1xf32, #tpu.memory_space<smem>>
    %c0_1 = arith.constant 0 : index
    %c0_2 = arith.constant 0 : index
    %1 = vector.load %arg1[%c0_1, %c0_2] : memref<32x38xf32, #tpu.memory_space<vmem>>, vector<32x38xf32>
    %c0_3 = arith.constant 0 : index
    %c0_4 = arith.constant 0 : index
    %2 = vector.load %arg2[%c0_3, %c0_4] : memref<38x64xf32, #tpu.memory_space<vmem>>, vector<38x64xf32>
    %cst = arith.constant dense<0.000000e+00> : vector<32x64xf32>
    %3 = tpu.matmul %1, %2, %cst {dimension_numbers = #tpu.dot_dimension_numbers<[1], [0], [0], [1], [0, 0, 1, 1], [], []>} : vector<32x38xf32>, vector<38x64xf32>, vector<32x64xf32> -> vector<32x64xf32>
    %c0_5 = arith.constant 0 : index
    %c0_6 = arith.constant 0 : index
    %4 = vector.load %arg3[%c0_5, %c0_6] : memref<1x64xf32, #tpu.memory_space<vmem>>, vector<1x64xf32>
    %5 = vector.broadcast %0 : f32 to vector<1x64xf32>
    %6 = arith.mulf %5, %4 : vector<1x64xf32>
    %7 = vector.broadcast %6 : vector<1x64xf32> to vector<32x64xf32>
    %8 = arith.addf %3, %7 : vector<32x64xf32>
    %c0_7 = arith.constant 0 : index
    %c0_8 = arith.constant 0 : index
    %9 = vector.load %arg4[%c0_7, %c0_8] : memref<1x64xf32, #tpu.memory_space<vmem>>, vector<1x64xf32>
    %10 = vector.broadcast %9 : vector<1x64xf32> to vector<32x64xf32>
    %11 = arith.addf %8, %10 : vector<32x64xf32>
    %12 = arith.negf %11 : vector<32x64xf32>
    %13 = math.exp %12 : vector<32x64xf32>
    %cst_9 = arith.constant 1.000000e+00 : f32
    %14 = vector.broadcast %cst_9 : f32 to vector<32x64xf32>
    %15 = arith.addf %14, %13 : vector<32x64xf32>
    %16 = arith.divf %14, %15 : vector<32x64xf32>
    %17 = arith.mulf %11, %16 : vector<32x64xf32>
    %c0_10 = arith.constant 0 : index
    %c0_11 = arith.constant 0 : index
    %18 = vector.load %arg5[%c0_10, %c0_11] : memref<64x128xf32, #tpu.memory_space<vmem>>, vector<64x128xf32>
    %cst_12 = arith.constant dense<0.000000e+00> : vector<32x128xf32>
    %19 = tpu.matmul %17, %18, %cst_12 {dimension_numbers = #tpu.dot_dimension_numbers<[1], [0], [0], [1], [0, 0, 1, 1], [], []>} : vector<32x64xf32>, vector<64x128xf32>, vector<32x128xf32> -> vector<32x128xf32>
    %c0_13 = arith.constant 0 : index
    %c0_14 = arith.constant 0 : index
    %20 = vector.load %arg6[%c0_13, %c0_14] : memref<1x128xf32, #tpu.memory_space<vmem>>, vector<1x128xf32>
    %21 = vector.broadcast %20 : vector<1x128xf32> to vector<32x128xf32>
    %22 = arith.addf %19, %21 : vector<32x128xf32>
    %c0_15 = arith.constant 0 : index
    %c0_16 = arith.constant 0 : index
    %23 = vector.load %arg7[%c0_15, %c0_16] : memref<32x128xf32, #tpu.memory_space<vmem>>, vector<32x128xf32>
    tpu.vector_store %arg7[%c0_15, %c0_16], %22 {strides = array<i32>} : memref<32x128xf32, #tpu.memory_space<vmem>>, vector<32x128xf32>,
    return
  }
}

</mosaic_0001>

<bundles_post_ra>
// kernel: model_wrapper_forward_padded.1
= control target key start
LH: loop header
LB: loop body
LE: loop exit
PB: predicated region body
PF: predicated region fallthrough
CT: control target
= control target key end

     0   :  { %13 = vsyncpa [#allocation4], 0  ;;  %s707_s0 = inlined_call_operand.<no memory space> [shape: f32[1,1], index: 0, kind: input, shape index: {}]   ;;  %s708_s1 = inlined_call_operand.hbm [shape: f32[32,38], index: 1, kind: input, shape index: {}]   ;;  %s709_s2 = inlined_call_operand.hbm [shape: f32[38,64], index: 2, kind: input, shape index: {}]   ;;  %s710_s3 = inlined_call_operand.vmem [shape: f32[1,64], index: 3, kind: input, shape index: {}]   ;;  %s711_s4 = inlined_call_operand.vmem [shape: f32[1,64], index: 4, kind: input, shape index: {}]   ;;  %s712_s5 = inlined_call_operand.hbm [shape: f32[64,128], index: 5, kind: input, shape index: {}]   ;;  %s713_s6 = inlined_call_operand.vmem [shape: f32[1,128], index: 6, kind: input, shape index: {}]   ;;  %s714_s7 = inlined_call_operand.hbm [shape: f32[32,128], index: 7, kind: output, shape index: {}]  }
   0x1   :  { %14 = vsyncpa [#allocation7], 0 }
   0x2   :  { %15 = vsyncpa [#allocation5], 0  ;;  %s578_s24 = smov [#allocation6]   ;;  %s579_s26 = smov [#allocation3]  }
   0x3   :  { %s35_s25 = sshll.u32 %s578_s24, 4  ;;  %s23_s27 = sshll.u32 %s579_s26, 4  ;;  %s36_s25 = int_to_ptr.vmem [resolvable:$true] %s35_s25  ;;  %s624_s27 = int_to_ptr.vmem [resolvable:$true] %s23_s27 }
   0x4   :  { %s484_s30 = scalar_lea.hbm %s709_s2, 640 }
   0x5   :  { %p485_p0 = scmp.ne.s32.totalorder %s709_s2, %s484_s30  ;;  %p488_p1 = scmp.lt.u32.totalorder %s484_s30, %s709_s2 }
   0x7   :  { %p490_p2 = pnand %p488_p1, %p485_p0 }
   0x9   :  { %493 = shalt.err (!%p490_p2)
}
   0xa   :  { %s494_s12 = scalar_lea.vmem %s36_s25, 640  ;;  %p499_p4 = scmp.lt.s32.totalorder %s36_s25, %s36_s25 }
   0xb   :  { %p495_p3 = scmp.ne.s32.totalorder %s36_s25, %s494_s12  ;;  %p500_p5 = scmp.lt.s32.totalorder %s494_s12, %s494_s12 }
   0xd   :  { %p501_p6 = por %p500_p5, %p499_p4 }
   0xf   :  { %p502_p7 = pnand %p501_p6, %p495_p3 }
  0x11   :  { %505 = shalt.err (!%p502_p7)
}
  0x12   :  { %s580_s13 = smov 128   ;;  %s581_s14 = smov 8  }
  0x13   :  { %41 = dma.hbm_to_vmem [thread:$0]  %s709_s2, 640, %s36_s25, [#allocation7], %s580_s13, %s580_s13, %s581_s14  }
  0x14   :  { %s506_s19 = scalar_lea.hbm %s708_s1, 512 }
  0x15   :  { %p507_p8 = scmp.ne.s32.totalorder %s708_s1, %s506_s19  ;;  %p510_p9 = scmp.lt.u32.totalorder %s506_s19, %s708_s1 }
  0x17   :  { %p512_p10 = pnand %p510_p9, %p507_p8 }
  0x19   :  { %515 = shalt.err (!%p512_p10)
}
  0x1a   :  { %s516_s24 = scalar_lea.vmem %s624_s27, 512  ;;  %p521_p12 = scmp.lt.s32.totalorder %s624_s27, %s624_s27 }
  0x1b   :  { %p517_p11 = scmp.ne.s32.totalorder %s624_s27, %s516_s24  ;;  %p522_p13 = scmp.lt.s32.totalorder %s516_s24, %s516_s24 }
  0x1d   :  { %p523_p0 = por %p522_p13, %p521_p12 }
  0x1f   :  { %p524_p1 = pnand %p523_p0, %p517_p11 }
  0x21   :  { %527 = shalt.err (!%p524_p1)
}
  0x22   :  { %29 = dma.hbm_to_vmem [thread:$0]  %s708_s1, 512, %s624_s27, [#allocation4], %s580_s13, %s580_s13, %s581_s14  }
  0x23   :  { %s582_s26 = smov [#allocation8]   ;;  %s528_s8 = scalar_lea.hbm %s712_s5, 1024 }
  0x24   :  { %s51_s28 = sshll.u32 %s582_s26, 4  ;;  %p529_p2 = scmp.ne.s32.totalorder %s712_s5, %s528_s8  ;;  %s52_s28 = int_to_ptr.vmem [resolvable:$true] %s51_s28 }
  0x25   :  { %p532_p3 = scmp.lt.u32.totalorder %s528_s8, %s712_s5 }
  0x27   :  { %p534_p4 = pnand %p532_p3, %p529_p2 }
  0x29   :  { %537 = shalt.err (!%p534_p4)
}
  0x2a   :  { %s538_s15 = scalar_lea.vmem %s52_s28, 1024  ;;  %p543_p6 = scmp.lt.s32.totalorder %s52_s28, %s52_s28 }
  0x2b   :  { %p539_p5 = scmp.ne.s32.totalorder %s52_s28, %s538_s15  ;;  %p544_p7 = scmp.lt.s32.totalorder %s538_s15, %s538_s15 }
  0x2d   :  { %p545_p8 = por %p544_p7, %p543_p6 }
  0x2f   :  { %p546_p9 = pnand %p545_p8, %p539_p5 }
  0x31   :  { %549 = shalt.err (!%p546_p9)
}
  0x32   :  { %57 = dma.hbm_to_vmem [thread:$0]  %s712_s5, 1024, %s52_s28, [#allocation7], %s580_s13, %s580_s13, %s581_s14  }
  0x33   :  { %572 = dma.done.wait [#allocation4], 512  }
  0x34   :  { %573 = vsyncadd [#allocation4], 4294966784 }
  0x35   :  { %574 = dma.done.wait [#allocation7], 1664  }
  0x36   :  { %575 = vsyncadd [#allocation7], 4294965632  ;;  %vm88_vm0 = vcmask 310272   ;;  %v74_v0 = vld [vmem:[#allocation6] sm:$0xff]  ;;  %v75_v1 = vld [vmem:[#allocation6 + $0x8] sm:$0xff]  ;;  %vm101_vm1 = vcmask 1045504   ;;  %v83_v23 = vlaneseq  ;;  %v80_v26 = vstv %s707_s0 }
  0x37   :  { %v76_v2 = vld [vmem:[#allocation6 + $0x10] sm:$0xff]  ;;  %v438_v3 = vpack.c.bf16 %v75_v1, %v74_v0  ;;  %v77_v4 = vld [vmem:[#allocation6 + $0x18] sm:$0xff]  ;;  %v70_v5 = vld [vmem:[#allocation3] sm:$0xff]  ;;  %vm244_vm2 = vcmask 523264  }
  0x38   :  { %v442_v6 = vpack.c.bf16 %v77_v4, %v76_v2  ;;  %410 = vmatprep.mubr.msk.f32.mxu0 %vm88_vm0, %v70_v5  ;;  %v78_v7 = vld [vmem:[#allocation6 + $0x20] sm:$0x3f]  ;;  %v71_v8 = vld [vmem:[#allocation3 + $0x8] sm:$0xff]  ;;  %v72_v9 = vld [vmem:[#allocation3 + $0x10] sm:$0xff]  ;;  %v84_v24 = vshrl.u32 %v83_v23, 7 }
  0x39   :  { %439 = vmatprep.subr.bf16.mxu0 %v438_v3  ;;  %v73_v10 = vld [vmem:[#allocation3 + $0x18] sm:$0xff]  ;;  %v229_v11 = vld [vmem:[#allocation8] sm:$0xff]  ;;  %v230_v12 = vld [vmem:[#allocation8 + $0x8] sm:$0xff] }
  0x3a   :  { %441 = vmatpush3.bf16.msra.mxu0 %v438_v3  ;;  %v446_v13 = vpack.c.bf16 %v230_v12, %v229_v11  ;;  %v231_v14 = vld [vmem:[#allocation8 + $0x10] sm:$0xff]  ;;  %v232_v15 = vld [vmem:[#allocation8 + $0x18] sm:$0xff]  ;;  %v233_v17 = vld [vmem:[#allocation8 + $0x20] sm:$0xff]  ;;  %v85_v28 = vsub.s32 0, %v84_v24 }
  0x3b   :  { %443 = vmatprep.subr.bf16.mxu0 %v442_v6  ;;  %v450_v16 = vpack.c.bf16 %v232_v15, %v231_v14  ;;  %v234_v18 = vld [vmem:[#allocation8 + $0x28] sm:$0xff]  ;;  %v235_v20 = vld [vmem:[#allocation8 + $0x30] sm:$0xff]  ;;  %v236_v21 = vld [vmem:[#allocation8 + $0x38] sm:$0xff] }
  0x3c   :  { %447 = vmatprep.subr.bf16.mxu1 %v446_v13  ;;  %v454_v19 = vpack.c.bf16 %v234_v18, %v233_v17  ;;  %v458_v22 = vpack.c.bf16 %v236_v21, %v235_v20  ;;  %v79_v25 = vld [vmem:[%s710_s3] sm:$0x1] }
  0x3d   :  { %449 = vmatpush3.bf16.msra.mxu1 %v446_v13  ;;  %v81_v27 = vmul.f32 %v80_v26, %v79_v25  ;;  %v369_v31 = vld [vmem:[%s711_s4] ss:$0 sm:$0xff]  ;;  %s583_s4 = smov [#allocation9]  }
  0x3e   :  { %445 = vmatpush3.bf16.msra.mxu0 %v442_v6  ;;  %451 = vmatprep.subr.bf16.mxu1 %v450_v16  ;;  %v374_v63 = vld [vmem:[%s713_s6] ss:$0 sm:$0xff]  ;;  %s351_s21 = sshll.u32 %s583_s4, 4  ;;  %s352_s21 = int_to_ptr.vmem [resolvable:$true] %s351_s21 }
  0x3f   :  { %408 = vmatprep.subr.msk.mxu0 %vm101_vm1, %v78_v7  ;;  %v86_v29 = vrot.slane %v81_v27, %v85_v28  ;;  %s550_s22 = scalar_lea.vmem %s352_s21, 512  ;;  %p555_p11 = scmp.lt.s32.totalorder %s352_s21, %s352_s21 }
  0x40   :  { %p551_p10 = scmp.ne.s32.totalorder %s352_s21, %s550_s22  ;;  %p556_p12 = scmp.lt.s32.totalorder %s550_s22, %s550_s22 }
  0x41   :  { %453 = vmatpush3.bf16.msra.mxu1 %v450_v16 }
  0x42   :  { %409 = vmatpush3.msk.msra.mxu0 %vm101_vm1, %v78_v7  ;;  %455 = vmatprep.subr.bf16.mxu1 %v454_v19  ;;  %p557_p13 = por %p556_p12, %p555_p11 }
  0x43   :  { %411 = vmatmul.mubr.msk.f32.vlgmr.msra.gmra.mrb[0].mxu0 %vm88_vm0, %v71_v8 }
  0x44   :  { %413 = vmatprep.mubr.msk.f32.mxu0 %vm88_vm0, %v72_v9  ;;  %p558_p0 = pnand %p557_p13, %p551_p10 }
  0x45   :  { %457 = vmatpush3.bf16.msra.mxu1 %v454_v19 }
  0x46   :  { %459 = vmatprep.subr.bf16.mxu1 %v458_v22 }
  0x47   :  { %414 = vmatmul.mubr.msk.f32.gmra.mrb[2].mxu0 %vm88_vm0, %v73_v10 }
  0x49   :  { %461 = vmatpush3.bf16.msra.mxu1 %v458_v22 }
 0x116   :  { %v412_v30 = vpop.f32.mrb[0].mxu0 }
 0x117   :  { %v177_v32 = vadd.f32 %v412_v30, %v86_v29  ;;  %v171_v33 = vpop.f32.mrb[1].mxu0 }
 0x118   :  { %v172_v34 = vadd.f32 %v171_v33, %v86_v29 }
 0x119   :  { %v198_v35 = vadd.f32 %v369_v31, %v177_v32 }
 0x11a   :  { %v197_v36 = vadd.f32 %v369_v31, %v172_v34  ;;  %v415_v37 = vpop.f32.mrb[2].mxu0 }
 0x11b   :  { %v371_v38 = vmul.f32 -1.442695, %v198_v35  ;;  %v187_v39 = vadd.f32 %v415_v37, %v86_v29  ;;  %v181_v40 = vpop.f32.mrb[3].mxu0 }
 0x11c   :  { %v370_v41 = vmul.f32 -1.442695, %v197_v36  ;;  %v182_v42 = vadd.f32 %v181_v40, %v86_v29 }
 0x11d   :  { %468 = vpow2.f32 %v371_v38  ;;  %v200_v43 = vadd.f32 %v369_v31, %v187_v39 }
 0x11e   :  { %470 = vpow2.f32 %v370_v41  ;;  %v199_v44 = vadd.f32 %v369_v31, %v182_v42 }
 0x11f   :  { %v373_v45 = vmul.f32 -1.442695, %v200_v43 }
 0x120   :  { %v372_v46 = vmul.f32 -1.442695, %v199_v44 }
 0x121   :  { %472 = vpow2.f32 %v373_v45 }
 0x122   :  { %474 = vpow2.f32 %v372_v46 }
 0x127   :  { %v469_v47 = vpop.eup %468 }
 0x128   :  { %v471_v48 = vpop.eup %470  ;;  %v214_v49 = vadd.f32 1.0, %v469_v47 }
 0x129   :  { %v213_v50 = vadd.f32 1.0, %v471_v48 }
 0x12a   :  { %476 = vrcp.f32 %v214_v49 }
 0x12b   :  { %v473_v51 = vpop.eup %472  ;;  %478 = vrcp.f32 %v213_v50 }
 0x12c   :  { %v475_v52 = vpop.eup %474  ;;  %v216_v53 = vadd.f32 1.0, %v473_v51 }
 0x12d   :  { %v215_v54 = vadd.f32 1.0, %v475_v52 }
 0x12e   :  { %480 = vrcp.f32 %v216_v53 }
 0x12f   :  { %482 = vrcp.f32 %v215_v54 }
 0x134   :  { %v477_v55 = vpop.eup %476 }
 0x135   :  { %v479_v56 = vpop.eup %478  ;;  %v226_v58 = vmul.f32 %v477_v55, %v198_v35 }
 0x136   :  { %v225_v57 = vmul.f32 %v479_v56, %v197_v36 }
 0x138   :  { %v481_v59 = vpop.eup %480  ;;  %432 = vmatprep.mubr.msk.f32.mxu1 %vm244_vm2, %v225_v57 }
 0x139   :  { %v483_v60 = vpop.eup %482  ;;  %433 = vmatmul.mubr.msk.f32.vlgmr.msra.gmra.mrb[0].mxu1 %vm244_vm2, %v226_v58  ;;  %v228_v62 = vmul.f32 %v481_v59, %v200_v43 }
 0x13a   :  { %v227_v61 = vmul.f32 %v483_v60, %v199_v44 }
 0x13c   :  { %435 = vmatprep.mubr.msk.f32.mxu1 %vm244_vm2, %v227_v61 }
 0x13d   :  { %436 = vmatmul.mubr.msk.f32.gmra.mrb[2].mxu1 %vm244_vm2, %v228_v62 }
 0x20c   :  { %v434_v0 = vpop.f32.mrb[0].mxu1 }
 0x20d   :  { %v329_v1 = vadd.f32 %v434_v0, %v374_v63  ;;  %v323_v2 = vpop.f32.mrb[1].mxu1 }
 0x20e   :  { %v324_v3 = vadd.f32 %v374_v63, %v323_v2 }
 0x20f   :  { %343 = vst [vmem:[#allocation9 + $0x8] sm:$0xff] %v329_v1 }
 0x210   :  { %342 = vst [vmem:[#allocation9] sm:$0xff] %v324_v3  ;;  %v437_v4 = vpop.f32.mrb[2].mxu1 }
 0x211   :  { %v339_v5 = vadd.f32 %v437_v4, %v374_v63  ;;  %v333_v6 = vpop.f32.mrb[3].mxu1 }
 0x212   :  { %v334_v7 = vadd.f32 %v374_v63, %v333_v6 }
 0x213   :  { %345 = vst [vmem:[#allocation9 + $0x18] sm:$0xff] %v339_v5 }
 0x214   :  { %344 = vst [vmem:[#allocation9 + $0x10] sm:$0xff] %v334_v7 }
 0x215   :  { %561 = shalt.err (!%p558_p0)
}
 0x216   :  { %s562_s24 = scalar_lea.hbm %s714_s7, 512 }
 0x217   :  { %p563_p1 = scmp.ne.s32.totalorder %s714_s7, %s562_s24  ;;  %p566_p2 = scmp.lt.u32.totalorder %s562_s24, %s714_s7 }
 0x219   :  { %p568_p3 = pnand %p566_p2, %p563_p1 }
 0x21b   :  { %571 = shalt.err (!%p568_p3)
}
 0x21c   :  { %357 = dma.vmem_to_hbm [thread:$0]  %s352_s21, 512, %s714_s7, [#allocation5], %s580_s13, %s580_s13, %s581_s14  }
 0x21d   :  { %576 = dma.done.wait [#allocation5], 512  }
 0x21e   :  { %577 = vsyncadd [#allocation5], 4294966784 }
 0x21f   :  { %361 = vsyncpa [#allocation4], 1 }
 0x220   :  { %362 = vsyncpa [#allocation7], 1 }
 0x221   :  { %363 = vsyncpa [#allocation5], 1 }

</bundles_post_ra>
